<compile_context>
chip_gen: v5e
topology: v5e:2x2
jax: 0.10.0
libtpu: 0.0.40
codegen_flags: <defaults>
</compile_context>

<pallas_src>
import functools

import jax
import jax.numpy as jnp
from jax.experimental import pallas as pl
from jax.experimental.pallas import tpu as pltpu

LANE = 128
SUBLANE = 8
HIDDEN = 16  # fixed by the nn.Module


def _round_up(x, m):
    return ((x + m - 1) // m) * m


def _make_mlp_kernel(in_pad, hidden, out_features):
    c_b1 = in_pad                       # column holding b1
    c_w2 = in_pad + 1                   # first column of w2^T (hidden, out)
    c_b2 = in_pad + 1 + out_features    # column holding b2 (rows 0:out)

    def kernel(p_ref, x_ref, o_ref):
        # Packed params: p_ref is (hidden, 128) f32, static lane slices.
        w1 = p_ref[:, 0:in_pad]                 # (hidden, in_pad)
        b1 = p_ref[:, c_b1:c_b1 + 1]            # (hidden, 1)

        # Layer 1: (hidden, in_pad) @ (in_pad, TB) -> (hidden, TB)   [MXU]
        h = jnp.dot(w1, x_ref[...], preferred_element_type=jnp.float32)
        h = jnp.maximum(h + b1, 0.0)            # bias + ReLU on the VPU

        if out_features == 1:
            # Layer 2 (N == 1): VPU multiply + sublane reduction instead of an
            # MXU matmul that would use a single systolic-array column.
            w2 = p_ref[:, c_w2:c_w2 + 1]        # (hidden, 1)
            b2 = p_ref[0:1, c_b2:c_b2 + 1]      # (1, 1)
            out = jnp.sum(h * w2, axis=0, keepdims=True) + b2   # (1, TB)
        else:
            # General (small) output width: still lane-dense along batch.
            w2t = p_ref[:, c_w2:c_w2 + out_features]            # (hidden, out)
            b2 = p_ref[0:out_features, c_b2:c_b2 + 1]           # (out, 1)
            out = jnp.dot(w2t.T, h, preferred_element_type=jnp.float32) + b2

        o_ref[...] = out.astype(o_ref.dtype)

    return kernel


@functools.partial(jax.jit, static_argnames=("block_b",))
def mlp_forward(x, w1, b1, w2, b2, *, block_b=512):
    """Forward pass of MLP.

    x : (B, input_size) f32
    w1: (16, input_size), b1: (16,)           -- torch nn.Linear layout
    w2: (output_size, 16), b2: (output_size,)
    returns (B, output_size) f32
    """
    B, in_features = x.shape
    hidden = w1.shape[0]
    out_features = w2.shape[0]
    assert hidden == HIDDEN and w2.shape[1] == hidden
    assert block_b % LANE == 0

    in_pad = _round_up(in_features, SUBLANE)
    # Packed slab layout must fit one 128-lane row: w1 | b1 | w2^T | b2
    assert in_pad + 1 + out_features + 1 <= LANE, "params too wide for packed slab"
    assert out_features <= hidden

    # ---- batch tiling (lane axis) ----
    b_min = _round_up(max(B, 1), LANE)
    tb = min(block_b, b_min)
    b_pad = _round_up(B, tb)
    grid = (b_pad // tb,)

    # ---- pack inputs outside the kernel ----
    # x^T, zero-padded: (in_pad, b_pad), batch on lanes.
    x_t = jnp.zeros((in_pad, b_pad), jnp.float32)
    x_t = x_t.at[:in_features, :B].set(x.T.astype(jnp.float32))

    # Single parameter slab: (hidden, 128).
    slab = jnp.zeros((hidden, LANE), jnp.float32)
    slab = slab.at[:, :in_features].set(w1.astype(jnp.float32))          # w1 (padded cols = 0)
    slab = slab.at[:, in_pad].set(b1.astype(jnp.float32))                # b1
    slab = slab.at[:, in_pad + 1:in_pad + 1 + out_features].set(
        w2.T.astype(jnp.float32))                                        # w2^T
    slab = slab.at[:out_features, in_pad + 1 + out_features].set(
        b2.astype(jnp.float32))                                          # b2

    kernel = _make_mlp_kernel(in_pad, hidden, out_features)

    flops = 2 * b_pad * (in_pad * hidden + hidden * out_features)
    bytes_accessed = 4 * (in_pad * b_pad + hidden * LANE + out_features * b_pad)

    out_t = pl.pallas_call(
        kernel,
        out_shape=jax.ShapeDtypeStruct((out_features, b_pad), jnp.float32),
        grid_spec=pltpu.PrefetchScalarGridSpec(
            num_scalar_prefetch=0,
            grid=grid,
            in_specs=[
                # Packed params: constant index_map -> resident across grid steps.
                pl.BlockSpec((hidden, LANE), lambda i: (0, 0)),
                # x^T tile: (in_pad, TB), batch-tiled along lanes.
                pl.BlockSpec((in_pad, tb), lambda i: (0, i)),
            ],
            out_specs=pl.BlockSpec((out_features, tb), lambda i: (0, i)),
        ),
        compiler_params=pltpu.CompilerParams(
            dimension_semantics=("parallel",),
        ),
        cost_estimate=pl.CostEstimate(
            flops=flops, transcendentals=0, bytes_accessed=bytes_accessed),
    )(slab, x_t)

    # Un-transpose / un-pad outside the kernel (layout plumbing, not compute).
    return out_t[:, :B].T


def init_params(key, input_size, hidden, output_size):
    """Deterministic init matching nn.Linear's default U(-1/sqrt(fan_in), 1/sqrt(fan_in)).

    Weights are kept in torch layout: w (out_features, in_features)."""
    k1, k2, k3, k4 = jax.random.split(key, 4)
    bound1 = 1.0 / jnp.sqrt(jnp.float32(input_size))
    bound2 = 1.0 / jnp.sqrt(jnp.float32(hidden))
    w1 = jax.random.uniform(k1, (hidden, input_size), jnp.float32, -bound1, bound1)
    b1 = jax.random.uniform(k2, (hidden,), jnp.float32, -bound1, bound1)
    w2 = jax.random.uniform(k3, (output_size, hidden), jnp.float32, -bound2, bound2)
    b2 = jax.random.uniform(k4, (output_size,), jnp.float32, -bound2, bound2)
    return w1, b1, w2, b2


if __name__ == "__main__":
    # Airfoil self-noise regression: 5 input features -> 1 scalar output.
    input_size, hidden, output_size = 5, HIDDEN, 1
    batch = 8

    key = jax.random.PRNGKey(0)
    kx, kp = jax.random.split(key)
    x = jax.random.normal(kx, (batch, input_size), jnp.float32)
    w1, b1, w2, b2 = init_params(kp, input_size, hidden, output_size)

    out = mlp_forward(x, w1, b1, w2, b2)
    out = jax.block_until_ready(out)

    # Pure-JAX reference of the forward semantics (torch layout weights).
    ref = jnp.maximum(x @ w1.T + b1, 0.0) @ w2.T + b2
    assert out.shape == (batch, output_size), out.shape
    assert jnp.allclose(out, ref, atol=1e-4, rtol=1e-4)

    print("KERNEL_OK")
</pallas_src>

<mosaic_0001>
module attributes {stable_mosaic.version = 11 : i64} {
  func.func @kernel(%arg0: i32, %arg1: memref<16x128xf32, #tpu.memory_space<vmem>>, %arg2: memref<8x128xf32, #tpu.memory_space<vmem>>, %arg3: memref<1x128xf32, #tpu.memory_space<vmem>>) attributes {dimension_semantics = [#tpu.dimension_semantics<parallel>], iteration_bounds = array<i64: 1>, scalar_prefetch = 0 : i64, scratch_operands = 0 : i64, tpu.core_type = #tpu.core_type<tc>, window_params = [{pipeline_mode = #tpu.pipeline_mode<synchronous>, transform_indices = @transform_0, window_bounds = array<i64: 16, 128>}, {transform_indices = @transform_1, window_bounds = array<i64: 8, 128>}, {transform_indices = @transform_2, window_bounds = array<i64: 1, 128>}]} {
    %c0 = arith.constant 0 : index
    %c0_0 = arith.constant 0 : index
    %0 = vector.load %arg1[%c0, %c0_0] : memref<16x128xf32, #tpu.memory_space<vmem>>, vector<16x8xf32>
    %c0_1 = arith.constant 0 : index
    %c8 = arith.constant 8 : index
    %1 = vector.load %arg1[%c0_1, %c8] : memref<16x128xf32, #tpu.memory_space<vmem>>, vector<16x1xf32>
    %c0_2 = arith.constant 0 : index
    %c0_3 = arith.constant 0 : index
    %2 = vector.load %arg2[%c0_2, %c0_3] : memref<8x128xf32, #tpu.memory_space<vmem>>, vector<8x128xf32>
    %cst = arith.constant dense<0.000000e+00> : vector<16x128xf32>
    %3 = tpu.matmul %0, %2, %cst {dimension_numbers = #tpu.dot_dimension_numbers<[1], [0], [0], [1], [0, 0, 1, 1], [], []>} : vector<16x8xf32>, vector<8x128xf32>, vector<16x128xf32> -> vector<16x128xf32>
    %4 = vector.broadcast %1 : vector<16x1xf32> to vector<16x128xf32>
    %5 = arith.addf %3, %4 : vector<16x128xf32>
    %cst_4 = arith.constant 0.000000e+00 : f32
    %6 = vector.broadcast %cst_4 : f32 to vector<16x128xf32>
    %7 = arith.maximumf %5, %6 : vector<16x128xf32>
    %c0_5 = arith.constant 0 : index
    %c9 = arith.constant 9 : index
    %8 = vector.load %arg1[%c0_5, %c9] : memref<16x128xf32, #tpu.memory_space<vmem>>, vector<16x1xf32>
    %c0_6 = arith.constant 0 : index
    %c10 = arith.constant 10 : index
    %9 = vector.load %arg1[%c0_6, %c10] : memref<16x128xf32, #tpu.memory_space<vmem>>, vector<1x1xf32>
    %10 = vector.broadcast %8 : vector<16x1xf32> to vector<16x128xf32>
    %11 = arith.mulf %7, %10 : vector<16x128xf32>
    %cst_7 = arith.constant dense<0.000000e+00> : vector<128xf32>
    %12 = vector.multi_reduction <add>, %11, %cst_7 [0] : vector<16x128xf32> to vector<128xf32>
    %13 = vector.shape_cast %12 : vector<128xf32> to vector<1x128xf32>
    %14 = vector.broadcast %9 : vector<1x1xf32> to vector<1x128xf32>
    %15 = arith.addf %13, %14 : vector<1x128xf32>
    %c0_8 = arith.constant 0 : index
    %c0_9 = arith.constant 0 : index
    %16 = vector.load %arg3[%c0_8, %c0_9] : memref<1x128xf32, #tpu.memory_space<vmem>>, vector<1x128xf32>
    tpu.vector_store %arg3[%c0_8, %c0_9], %15 {strides = array<i32>} : memref<1x128xf32, #tpu.memory_space<vmem>>, vector<1x128xf32>,
    return
  }
  func.func @transform_0(%arg0: i32) -> (i32, i32) {
    %c0_i32 = arith.constant 0 : i32
    %c0_i32_0 = arith.constant 0 : i32
    %c0_i32_1 = arith.constant 0 : i32
    return %c0_i32, %c0_i32_0 : i32, i32
  }
  func.func @transform_1(%arg0: i32) -> (i32, i32) {
    %c0_i32 = arith.constant 0 : i32
    %c0_i32_0 = arith.constant 0 : i32
    return %c0_i32, %arg0 : i32, i32
  }
  func.func @transform_2(%arg0: i32) -> (i32, i32) {
    %c0_i32 = arith.constant 0 : i32
    %c0_i32_0 = arith.constant 0 : i32
    return %c0_i32, %arg0 : i32, i32
  }
}

</mosaic_0001>

<bundles_post_ra>
// kernel: mlp_forward.1
= control target key start
LH: loop header
LB: loop body
LE: loop exit
PB: predicated region body
PF: predicated region fallthrough
CT: control target
= control target key end

     0   :  { %v93_v0 = vmov 9   ;;  %v94_v1 = vmov 8   ;;  %vm24_vm0 = vcmask 64512   ;;  %v95_v6 = vmov 10   ;;  %s126_s1 = inlined_call_operand.vmem [shape: f32[8,128], index: 1, kind: input, shape index: {}]   ;;  %s127_s0 = inlined_call_operand.vmem [shape: f32[16,128], index: 0, kind: input, shape index: {}]   ;;  %s128_s2 = inlined_call_operand.vmem [shape: f32[1,128], index: 2, kind: output, shape index: {}]  }
   0x1   :  { %90 = vset.pattern.permute.xlu1 %v93_v0  ;;  %89 = vset.pattern.permute.xlu0 %v94_v1  ;;  %v13_v2 = vld [vmem:[%s126_s1] sm:$0xff]  ;;  %v12_v4 = vld [vmem:[%s127_s0 + $0x8] sm:$0xff] }
   0x2   :  { %v11_v3 = vld [vmem:[%s127_s0] sm:$0xff]  ;;  %44 = vmatpush.msra.mxu0 %v13_v2  ;;  %85 = vmatpush.msra.mxu1 %v13_v2 }
   0x3   :  { %56 = vperm.xlu1 %90, %v11_v3   ;;  %16 = vperm.xlu0 %89, %v11_v3   ;;  %v54_v5 = vld [vmem:[%s127_s0] sm:$0x1] }
   0x4   :  { %83 = vmatmul.msk.f32.vlgmr.msra.gmra.mxu0 %vm24_vm0, %v11_v3  ;;  %84 = vmatmul.msk.f32.vlgmr.msra.gmra.mxu1 %vm24_vm0, %v12_v4 }
   0x5   :  { %91 = vset.pattern.permute.xlu2 %v95_v6 }
   0x6   :  { %74 = vperm.xlu2 %91, %v54_v5  }
   0xb   :  { %60 = vperm.xlu1 %90, %v12_v4   ;;  %21 = vperm.xlu0 %89, %v12_v4  }
  0x13   :  { %92 = vset.pattern.permute.xlu0 %v95_v6 }
  0x60   :  { %v75_v25 = vpop.permute.xlu2 %74 }
  0x75   :  { %v17_v7 = vpop.permute.xlu0 %16  ;;  %v57_v8 = vpop.permute.xlu1 %56 }
  0x7d   :  { %v22_v9 = vpop.permute.xlu0 %21  ;;  %v61_v16 = vpop.permute.xlu1 %60 }
  0x81   :  { %v46_v10 = vpop.f32.mrf.mxu0  ;;  %v49_v11 = vpop.f32.mrf.mxu1 }
  0x82   :  { %v47_v12 = vadd.f32 %v46_v10, %v17_v7  ;;  %v50_v13 = vadd.f32 %v49_v11, %v22_v9 }
  0x84   :  { %v52_v14 = vmax.f32 %v47_v12, 0.0  ;;  %v53_v15 = vmax.f32 %v50_v13, 0.0 }
  0x86   :  { %v63_v17 = vmul.f32 %v57_v8, %v52_v14  ;;  %v64_v18 = vmul.f32 %v61_v16, %v53_v15 }
  0x88   :  { %v65_v19 = vadd.f32 %v64_v18, %v63_v17 }
  0x8a   :  { %v66_v20 = vrot.slane %v65_v19, 4 }
  0x8c   :  { %v67_v21 = vadd.f32 %v66_v20, %v65_v19 }
  0x8e   :  { %v68_v22 = vrot.slane %v67_v21, 2 }
  0x90   :  { %v69_v23 = vadd.f32 %v68_v22, %v67_v21 }
  0x92   :  { %v70_v24 = vrot.slane %v69_v23, 1 }
  0x94   :  { %v71_v26 = vadd.f32 %v70_v24, %v69_v23 }
  0x96   :  { %v77_v27 = vadd.f32 %v75_v25, %v71_v26 }
  0x98   :  { %78 = vst [vmem:[%s128_s2] sm:$0x1] %v77_v27 }

</bundles_post_ra>
